<compile_context>
chip_gen: v7x
topology: tpu7x:2x2x1
jax: 0.10.0
libtpu: 0.0.40
codegen_flags: <defaults>
</compile_context>

<pallas_src>
import jax
import jax.numpy as jnp
from jax import lax
from jax.experimental import pallas as pl
from jax.experimental.pallas import tpu as pltpu


def _round_up(x, m):
    return ((x + m - 1) // m) * m


# a[m, k] (x) b[n, k] -> [m, n]   (i.e. a @ b.T, transposed-RHS MXU contraction)
_DN_T = (((1,), (1,)), ((), ()))


def ffn_kernel_resident(x_ref, w1_ref, b1_ref, w2_ref, b2_ref, o_ref):
    """kt == 1: full hidden per step, weights VMEM-resident, direct output write."""
    h = lax.dot_general(x_ref[...], w1_ref[...], _DN_T,
                        preferred_element_type=jnp.float32)
    h = jnp.maximum(h + b1_ref[...], 0.0)                 # bias + ReLU
    # dropout: identity in inference mode.
    out = lax.dot_general(h.astype(w2_ref.dtype), w2_ref[...], _DN_T,
                          preferred_element_type=jnp.float32)
    o_ref[...] = (out + b2_ref[...]).astype(o_ref.dtype)


def ffn_kernel_acc(x_ref, w1_ref, b1_ref, w2_ref, b2_ref, o_ref, acc_ref):
    """kt > 1: hidden axis tiled; fp32 accumulator over hidden tiles."""
    k = pl.program_id(1)

    h = lax.dot_general(x_ref[...], w1_ref[...], _DN_T,
                        preferred_element_type=jnp.float32)
    h = jnp.maximum(h + b1_ref[...], 0.0)                 # bias + ReLU
    # dropout: identity in inference mode.
    p = lax.dot_general(h.astype(w2_ref.dtype), w2_ref[...], _DN_T,
                        preferred_element_type=jnp.float32)

    # First hidden tile overwrites (no separate zero-init pass), rest accumulate.
    @pl.when(k == 0)
    def _init():
        acc_ref[...] = p

    @pl.when(k > 0)
    def _accum():
        acc_ref[...] += p

    @pl.when(k == pl.num_programs(1) - 1)
    def _finalize():
        o_ref[...] = (acc_ref[...] + b2_ref[...]).astype(o_ref.dtype)


def positionwise_feed_forward(x, w1, b1, w2, b2, *, tm=512, th=None,
                              compute_dtype=None):
    """x: [B, S, d_model]; w1: [hidden, d_model]; b1: [hidden];
    w2: [d_model, hidden]; b2: [d_model]   (PyTorch nn.Linear conventions).

    tm: token-row tile (default 512; clamped/rounded for small M).
    th: optional hidden-reduction tile (must be a 128-multiple divisor of
        hidden); default None = auto (prefers full-hidden / resident weights).
    compute_dtype: optional cast (e.g. jnp.bfloat16) for x/w1/w2; accumulation
        stays fp32 and the output keeps x's original dtype.
    """
    B, S, d_model = x.shape
    hidden = w1.shape[0]
    M = B * S
    out_dtype = x.dtype

    if compute_dtype is not None:
        x = x.astype(compute_dtype)
        w1 = w1.astype(compute_dtype)
        w2 = w2.astype(compute_dtype)

    x2 = x.reshape(M, d_model)
    b1_2 = b1.reshape(1, hidden).astype(jnp.float32)
    b2_2 = b2.reshape(1, d_model).astype(jnp.float32)

    xbytes = jnp.dtype(x2.dtype).itemsize
    wbytes = jnp.dtype(w1.dtype).itemsize
    obytes = jnp.dtype(out_dtype).itemsize
    sub = 8 if xbytes >= 4 else (16 if xbytes == 2 else 32)   # sublane packing

    # ---- VMEM budget (v5e/v6e: 128 MiB, v7x: 64 MiB physical) ---------------
    try:
        phys_vmem = int(pltpu.get_tpu_info().vmem_capacity_bytes)
    except Exception:
        phys_vmem = 64 * 2**20                                # conservative (v7x)
    vmem_cap = min(100 * 2**20, max(32 * 2**20, phys_vmem - 16 * 2**20))
    budget = int(0.9 * vmem_cap)

    def footprint(tm_, th_):
        f = 2 * tm_ * d_model * xbytes                        # x tiles (dbl-buffered)
        f += 2 * th_ * d_model * wbytes                       # w1 tiles
        f += 2 * d_model * th_ * wbytes                       # w2 tiles
        f += 2 * (th_ + d_model) * 4                          # biases (fp32)
        f += 2 * tm_ * d_model * obytes                       # out tiles
        if th_ < hidden:
            f += tm_ * d_model * 4                            # fp32 accumulator
        return f

    # ---- tile sizing ---------------------------------------------------------
    tm_max = max(sub, _round_up(M, sub))
    tm = min(_round_up(max(int(tm), sub), sub), tm_max)

    # hidden-tile candidates: full hidden first (resident weights, kt == 1),
    # then 128-multiple divisors of hidden in descending order.
    cands = [hidden]
    if hidden % 128 == 0 and hidden > 128:
        nblk = hidden // 128
        cands += [g * 128 for g in range(nblk - 1, 0, -1) if nblk % g == 0]

    def _auto_tiles(tm0):
        tm_try = tm0
        while True:
            for c in cands:
                if footprint(tm_try, c) <= budget:
                    return tm_try, c
            if tm_try <= sub:
                return sub, cands[-1]                          # best effort
            tm_try = max(sub, _round_up(tm_try // 2, sub))

    if th is not None and (th == hidden or (hidden % th == 0 and th % 128 == 0)):
        th = int(th)                                           # explicit user choice
    else:
        tm, th = _auto_tiles(tm)

    kt = hidden // th if th < hidden else 1
    mt = pl.cdiv(M, tm)

    # v7x megacore: with resident weights, give the parallel row axis >= 2 steps
    # so it can shard across both TensorCores (cheap: weights DMA'd once anyway).
    if kt == 1 and mt == 1 and tm >= 2 * sub and M > sub:
        tm = _round_up(pl.cdiv(tm, 2), sub)
        mt = pl.cdiv(M, tm)

    vmem_limit = int(min(vmem_cap, max(8 * 2**20, footprint(tm, th) + (4 << 20))))

    # ---- cost hint (reflects weight re-streaming when kt > 1) ----------------
    w_stream = int((w1.nbytes + w2.nbytes + b1_2.nbytes) * (mt if kt > 1 else 1))
    cost = pl.CostEstimate(
        flops=4 * M * d_model * hidden,                        # two matmuls
        transcendentals=0,
        bytes_accessed=int(x2.nbytes + M * d_model * obytes + w_stream
                           + b2_2.nbytes))

    if kt == 1:
        grid_spec = pltpu.PrefetchScalarGridSpec(
            num_scalar_prefetch=0,
            grid=(mt,),
            in_specs=[
                pl.BlockSpec((tm, d_model), lambda i: (i, 0)),
                pl.BlockSpec((hidden, d_model), lambda i: (0, 0)),   # resident
                pl.BlockSpec((1, hidden), lambda i: (0, 0)),
                pl.BlockSpec((d_model, hidden), lambda i: (0, 0)),   # resident
                pl.BlockSpec((1, d_model), lambda i: (0, 0)),
            ],
            out_specs=pl.BlockSpec((tm, d_model), lambda i: (i, 0)),
        )
        kernel = ffn_kernel_resident
        dim_sem = ("parallel",)
    else:
        grid_spec = pltpu.PrefetchScalarGridSpec(
            num_scalar_prefetch=0,
            grid=(mt, kt),                                     # hidden reduction last
            in_specs=[
                pl.BlockSpec((tm, d_model), lambda i, k: (i, 0)),
                pl.BlockSpec((th, d_model), lambda i, k: (k, 0)),
                pl.BlockSpec((1, th), lambda i, k: (0, k)),
                pl.BlockSpec((d_model, th), lambda i, k: (0, k)),
                pl.BlockSpec((1, d_model), lambda i, k: (0, 0)),
            ],
            out_specs=pl.BlockSpec((tm, d_model), lambda i, k: (i, 0)),
            scratch_shapes=[pltpu.VMEM((tm, d_model), jnp.float32)],
        )
        kernel = ffn_kernel_acc
        dim_sem = ("parallel", "arbitrary")

    out2 = pl.pallas_call(
        kernel,
        out_shape=jax.ShapeDtypeStruct((M, d_model), out_dtype),
        grid_spec=grid_spec,
        compiler_params=pltpu.CompilerParams(
            dimension_semantics=dim_sem,
            vmem_limit_bytes=vmem_limit),
        cost_estimate=cost,
    )(x2, w1, b1_2, w2, b2_2)

    return out2.reshape(B, S, d_model)


if __name__ == "__main__":
    key = jax.random.PRNGKey(0)

    def make_params(k, d_model, hidden):
        k1, kb1, k2, kb2 = jax.random.split(k, 4)
        bound1 = 1.0 / (d_model ** 0.5)
        w1 = jax.random.uniform(k1, (hidden, d_model), minval=-bound1,
                                maxval=bound1, dtype=jnp.float32)
        b1 = jax.random.uniform(kb1, (hidden,), minval=-bound1,
                                maxval=bound1, dtype=jnp.float32)
        bound2 = 1.0 / (hidden ** 0.5)
        w2 = jax.random.uniform(k2, (d_model, hidden), minval=-bound2,
                                maxval=bound2, dtype=jnp.float32)
        b2 = jax.random.uniform(kb2, (d_model,), minval=-bound2,
                                maxval=bound2, dtype=jnp.float32)
        return w1, b1, w2, b2

    def ref_ffn(x, w1, b1, w2, b2):
        return jnp.maximum(x @ w1.T + b1, 0.0) @ w2.T + b2

    # Case 1: small shapes -> resident-weight kernel (kt=1), direct output write.
    kx, kp, key = jax.random.split(key, 3)
    B, S, d_model, hidden = 2, 8, 32, 64
    x = jax.random.normal(kx, (B, S, d_model), dtype=jnp.float32)
    w1, b1, w2, b2 = make_params(kp, d_model, hidden)
    out = positionwise_feed_forward(x, w1, b1, w2, b2)
    jax.block_until_ready(out)
    assert out.shape == (B, S, d_model)
    assert jnp.allclose(out, ref_ffn(x, w1, b1, w2, b2), atol=1e-4, rtol=1e-4)

    # Case 2: explicit tm/th -> ragged row tiling (M=40, tm=32) and the
    # hidden-axis reduction (kt=2) with the fp32 VMEM accumulator.
    kx, kp, key = jax.random.split(key, 3)
    B, S, d_model, hidden = 2, 20, 128, 256
    x = jax.random.normal(kx, (B, S, d_model), dtype=jnp.float32)
    w1, b1, w2, b2 = make_params(kp, d_model, hidden)
    out = positionwise_feed_forward(x, w1, b1, w2, b2, tm=32, th=128)
    jax.block_until_ready(out)
    assert out.shape == (B, S, d_model)
    assert jnp.allclose(out, ref_ffn(x, w1, b1, w2, b2), atol=1e-4, rtol=1e-4)

    # Case 3: bf16 compute path (fp32 accumulation), auto tiling, resident weights.
    kx, kp, key = jax.random.split(key, 3)
    B, S, d_model, hidden = 2, 64, 256, 512
    x = jax.random.normal(kx, (B, S, d_model), dtype=jnp.float32)
    w1, b1, w2, b2 = make_params(kp, d_model, hidden)
    out = positionwise_feed_forward(x, w1, b1, w2, b2, compute_dtype=jnp.bfloat16)
    jax.block_until_ready(out)
    assert out.shape == (B, S, d_model)
    assert jnp.allclose(out, ref_ffn(x, w1, b1, w2, b2), atol=2e-2, rtol=2e-2)

    print("KERNEL_OK")
</pallas_src>

<mosaic_0001>
module attributes {stable_mosaic.version = 11 : i64} {
  func.func @ffn_kernel_resident(%arg0: i32, %arg1: memref<8x32xf32, #tpu.memory_space<vmem>>, %arg2: memref<64x32xf32, #tpu.memory_space<vmem>>, %arg3: memref<1x64xf32, #tpu.memory_space<vmem>>, %arg4: memref<32x64xf32, #tpu.memory_space<vmem>>, %arg5: memref<1x32xf32, #tpu.memory_space<vmem>>, %arg6: memref<8x32xf32, #tpu.memory_space<vmem>>) attributes {dimension_semantics = [#tpu.dimension_semantics<parallel>], iteration_bounds = array<i64: 2>, scalar_prefetch = 0 : i64, scratch_operands = 0 : i64, tpu.core_type = #tpu.core_type<tc>, window_params = [{transform_indices = @transform_0, window_bounds = array<i64: 8, 32>}, {pipeline_mode = #tpu.pipeline_mode<synchronous>, transform_indices = @transform_1, window_bounds = array<i64: 64, 32>}, {pipeline_mode = #tpu.pipeline_mode<synchronous>, transform_indices = @transform_2, window_bounds = array<i64: 1, 64>}, {pipeline_mode = #tpu.pipeline_mode<synchronous>, transform_indices = @transform_3, window_bounds = array<i64: 32, 64>}, {pipeline_mode = #tpu.pipeline_mode<synchronous>, transform_indices = @transform_4, window_bounds = array<i64: 1, 32>}, {transform_indices = @transform_5, window_bounds = array<i64: 8, 32>}]} {
    %c0 = arith.constant 0 : index
    %c0_0 = arith.constant 0 : index
    %0 = vector.load %arg1[%c0, %c0_0] : memref<8x32xf32, #tpu.memory_space<vmem>>, vector<8x32xf32>
    %c0_1 = arith.constant 0 : index
    %c0_2 = arith.constant 0 : index
    %1 = vector.load %arg2[%c0_1, %c0_2] : memref<64x32xf32, #tpu.memory_space<vmem>>, vector<64x32xf32>
    %cst = arith.constant dense<0.000000e+00> : vector<8x64xf32>
    %2 = tpu.matmul %0, %1, %cst {dimension_numbers = #tpu.dot_dimension_numbers<[1], [1], [0], [0], [0, 0, 1, 0], [], []>} : vector<8x32xf32>, vector<64x32xf32>, vector<8x64xf32> -> vector<8x64xf32>
    %c0_3 = arith.constant 0 : index
    %c0_4 = arith.constant 0 : index
    %3 = vector.load %arg3[%c0_3, %c0_4] : memref<1x64xf32, #tpu.memory_space<vmem>>, vector<1x64xf32>
    %4 = vector.broadcast %3 : vector<1x64xf32> to vector<8x64xf32>
    %5 = arith.addf %2, %4 : vector<8x64xf32>
    %cst_5 = arith.constant 0.000000e+00 : f32
    %6 = vector.broadcast %cst_5 : f32 to vector<8x64xf32>
    %7 = arith.maximumf %5, %6 : vector<8x64xf32>
    %c0_6 = arith.constant 0 : index
    %c0_7 = arith.constant 0 : index
    %8 = vector.load %arg4[%c0_6, %c0_7] : memref<32x64xf32, #tpu.memory_space<vmem>>, vector<32x64xf32>
    %cst_8 = arith.constant dense<0.000000e+00> : vector<8x32xf32>
    %9 = tpu.matmul %7, %8, %cst_8 {dimension_numbers = #tpu.dot_dimension_numbers<[1], [1], [0], [0], [0, 0, 1, 0], [], []>} : vector<8x64xf32>, vector<32x64xf32>, vector<8x32xf32> -> vector<8x32xf32>
    %c0_9 = arith.constant 0 : index
    %c0_10 = arith.constant 0 : index
    %10 = vector.load %arg5[%c0_9, %c0_10] : memref<1x32xf32, #tpu.memory_space<vmem>>, vector<1x32xf32>
    %11 = vector.broadcast %10 : vector<1x32xf32> to vector<8x32xf32>
    %12 = arith.addf %9, %11 : vector<8x32xf32>
    %c0_11 = arith.constant 0 : index
    %c0_12 = arith.constant 0 : index
    %13 = vector.load %arg6[%c0_11, %c0_12] : memref<8x32xf32, #tpu.memory_space<vmem>>, vector<8x32xf32>
    tpu.vector_store %arg6[%c0_11, %c0_12], %12 {strides = array<i32>} : memref<8x32xf32, #tpu.memory_space<vmem>>, vector<8x32xf32>,
    return
  }
  func.func @transform_0(%arg0: i32) -> (i32, i32) {
    %c0_i32 = arith.constant 0 : i32
    %c0_i32_0 = arith.constant 0 : i32
    return %arg0, %c0_i32 : i32, i32
  }
  func.func @transform_1(%arg0: i32) -> (i32, i32) {
    %c0_i32 = arith.constant 0 : i32
    %c0_i32_0 = arith.constant 0 : i32
    %c0_i32_1 = arith.constant 0 : i32
    return %c0_i32, %c0_i32_0 : i32, i32
  }
  func.func @transform_2(%arg0: i32) -> (i32, i32) {
    %c0_i32 = arith.constant 0 : i32
    %c0_i32_0 = arith.constant 0 : i32
    %c0_i32_1 = arith.constant 0 : i32
    return %c0_i32, %c0_i32_0 : i32, i32
  }
  func.func @transform_3(%arg0: i32) -> (i32, i32) {
    %c0_i32 = arith.constant 0 : i32
    %c0_i32_0 = arith.constant 0 : i32
    %c0_i32_1 = arith.constant 0 : i32
    return %c0_i32, %c0_i32_0 : i32, i32
  }
  func.func @transform_4(%arg0: i32) -> (i32, i32) {
    %c0_i32 = arith.constant 0 : i32
    %c0_i32_0 = arith.constant 0 : i32
    %c0_i32_1 = arith.constant 0 : i32
    return %c0_i32, %c0_i32_0 : i32, i32
  }
  func.func @transform_5(%arg0: i32) -> (i32, i32) {
    %c0_i32 = arith.constant 0 : i32
    %c0_i32_0 = arith.constant 0 : i32
    return %arg0, %c0_i32 : i32, i32
  }
}

</mosaic_0001>

<bundles_post_ra>
// kernel: tpu_custom_call.1
= control target key start
LH: loop header
LB: loop body
LE: loop exit
PB: predicated region body
PF: predicated region fallthrough
CT: control target
= control target key end

     0   :  { %10 = vsyncpa [#allocation3], 0  ;;  %s901_s0 = inlined_call_operand.vmem [shape: f32[16,32], index: 0, kind: input, shape index: {}]   ;;  %s902_s1 = inlined_call_operand.vmem [shape: f32[64,32], index: 1, kind: input, shape index: {}]   ;;  %s903_s2 = inlined_call_operand.vmem [shape: f32[1,64], index: 2, kind: input, shape index: {}]   ;;  %s904_s3 = inlined_call_operand.vmem [shape: f32[32,64], index: 3, kind: input, shape index: {}]   ;;  %s905_s4 = inlined_call_operand.vmem [shape: f32[1,32], index: 4, kind: input, shape index: {}]   ;;  %s906_s5 = inlined_call_operand.hbm [shape: f32[16,32], index: 5, kind: output, shape index: {}]  }
   0x1   :  { %12 = vsyncpa [#allocation3 + $0x1], 0  ;;  %s740_s18 = smov 0   ;;  %s742_s19 = smov 0  }
   0x2   :  { %s744_s20 = smov 0   ;;  %s746_s21 = smov 0  }
   0x3 LB: > { %s761_s22 = sadd.s32 4294967295, %s704_s21   ;;  %s506_s23 = sadd.s32 4294967294, %s704_s21   ;;  %s704_s21 = sphi %s746_s21, %s914_s21   ;;  %s700_s20 = sphi %s744_s20, %s913_s20   ;;  %s696_s19 = sphi %s742_s19, %s912_s19   ;;  %s692_s18 = sphi %s740_s18, %s911_s18  }
   0x4   : > { %s765_s24 = sadd.s32 1, %s704_s21   ;;  %s135_s25 = sadd.s32 1, %s700_s20 }
   0x5   : > { %s132_s26 = ssub.s32 %s704_s21, %s765_s24  ;;  %p145_p0 = scmp.ne.s32.totalorder %s700_s20, %s696_s19 }
   0x6   : > { %p133_p1 = scmp.eq.s32.totalorder %s132_s26, 0  ;;  %p146_p2 = scmp.eq.s32.totalorder %s761_s22, 1 }
   0x7   : > { %p151_p3 = scmp.ne.s32.totalorder %s696_s19, %s692_s18  ;;  %p152_p4 = scmp.eq.s32.totalorder %s506_s23, 1 }
   0x8   : > { %s776_s27 = scalar_select %p133_p1, %s700_s20, %s135_s25  }
   0x9   : > { %p778_p5 = por %p146_p2, %p145_p0  ;;  %p782_p6 = por %p152_p4, %p151_p3 }
   0xa   : > { %p509_p7 = scmp.ge.s32.totalorder %s704_s21, 1  ;;  %p189_p8 = scmp.lt.s32.totalorder %s704_s21, 3 }
   0xc   : > { %p190_p9 = pnand %p509_p7, %p189_p8 }
   0xd   : > { %v221_v0 = vld [vmem:[%s902_s1] sm:$0xff] (!%p190_p9)  ;;  %v222_v1 = vld [vmem:[%s902_s1 + $0x8] sm:$0xff] (!%p190_p9)  ;;  %vm236_vm0 = vcmask (!%p190_p9), 261120   ;;  %v706_v2 = vmov (!%p190_p9), 0.0|0.0   ;;  %vm346_vm2 = vcmask (!%p190_p9), 523264   ;;  %vm707_vm3 = vmmov (!%p190_p9), 0  }
   0xe   : > { %193 = sbr.rel (%p190_p9) target bundleno = 491 (0x1eb), region = 40  ;;  %576 = vmatprep.subr.bf16.mxu0 (!%p190_p9), %v706_v2  ;;  %v577_v3 = vpack.c.bf16 (!%p190_p9), %v222_v1, %v221_v0  ;;  %vm796_vm1 = vmpackc.low (!%p190_p9), %vm236_vm0, %vm236_vm0  ;;  %592 = vmatprep.subr.bf16.mxu1 (!%p190_p9), %v706_v2  ;;  %v708_v5 = vmov (!%p190_p9), 0.0   ;;  %v335_v6 = vld [vmem:[%s904_s3] sm:$0xff] (!%p190_p9)  ;;  %v336_v7 = vld [vmem:[%s904_s3 + $0x8] sm:$0xff] (!%p190_p9)  ;;  %p216_p10 = scmp.lt.s32.totalorder (!%p190_p9), %s761_s22, 1 }
   0xf   : > { %562 = vmatprep.mubr.msk.f32.mxu0 (!%p190_p9), %vm707_vm3, %v708_v5  ;;  %573 = vmatprep.mubr.msk.f32.mxu1 (!%p190_p9), %vm707_vm3, %v708_v5  ;;  %vm594_vm4 = vmpackc.low (!%p190_p9), %vm346_vm2, %vm346_vm2  ;;  %v223_v8 = vld [vmem:[%s902_s1 + $0x10] sm:$0xff] (!%p190_p9)  ;;  %v224_v9 = vld [vmem:[%s902_s1 + $0x18] sm:$0xff] (!%p190_p9)  ;;  %v593_v10 = vpack.c.bf16 (!%p190_p9), %v336_v7, %v335_v6  ;;  %s213_s26 = sand.u32 (!%p190_p9), 1, %s696_s19   ;;  %s529_s8 = sshll.u32 (!%p190_p9), %s761_s22, 7 }
  0x10   : > { %579 = vmatpush3.bf16.xpose.msk.msra.mxu0 (!%p190_p9), %vm796_vm1, %v577_v3  ;;  %v581_v11 = vpack.c.bf16 (!%p190_p9), %v224_v9, %v223_v8  ;;  %v337_v12 = vld [vmem:[%s904_s3 + $0x10] sm:$0xff] (!%p190_p9)  ;;  %v338_v13 = vld [vmem:[%s904_s3 + $0x18] sm:$0xff] (!%p190_p9)  ;;  %v225_v15 = vld [vmem:[%s902_s1 + $0x20] sm:$0xff] (!%p190_p9)  ;;  %s510_s30 = sshll.u32 (!%p190_p9), %s213_s26, 3 }
  0x11   : > { %580 = vmatprep.subr.bf16.mxu0 (!%p190_p9), %v706_v2  ;;  %595 = vmatpush3.bf16.xpose.msk.msra.mxu1 (!%p190_p9), %vm594_vm4, %v593_v10  ;;  %v597_v14 = vpack.c.bf16 (!%p190_p9), %v338_v13, %v337_v12  ;;  %v226_v16 = vld [vmem:[%s902_s1 + $0x28] sm:$0xff] (!%p190_p9)  ;;  %v227_v18 = vld [vmem:[%s902_s1 + $0x30] sm:$0xff] (!%p190_p9)  ;;  %v228_v19 = vld [vmem:[%s902_s1 + $0x38] sm:$0xff] (!%p190_p9)  ;;  %s215_s9 = scalar_lea.vmem (!%p190_p9), [#allocation2], %s510_s30 }
  0x12   : > { %596 = vmatprep.subr.bf16.mxu1 (!%p190_p9), %v706_v2  ;;  %v585_v17 = vpack.c.bf16 (!%p190_p9), %v226_v16, %v225_v15  ;;  %v589_v20 = vpack.c.bf16 (!%p190_p9), %v228_v19, %v227_v18  ;;  %v512_v22 = vld [vmem:[%s903_s2] ss:$0 sm:$0xff] (!%p190_p9)  ;;  %s447_s10 = sshll.u32 (!%p190_p9), %s215_s9, 4  ;;  %s860_s10 = int_to_ptr.vmem [resolvable:$true] %s447_s10 }
  0x13   : > { %v522_v27 = vld [vmem:[%s905_s4] ss:$0 sm:$0xff] (!%p190_p9)  ;;  %s642_s15 = scalar_lea.vmem (!%p190_p9), %s860_s10, 128 }
  0x14   : > { %p643_p11 = scmp.ne.s32.totalorder (!%p190_p9), %s860_s10, %s642_s15 }
  0x15   : > { %s217_s13 = scalar_select %p216_p10, %s761_s22, 1 }
  0x16   : > { %p644_p12 = pnand %p643_p11, %p778_p5  ;;  %s709_s22 = smov [#allocation2]  }
  0x17   : > { %s511_s14 = sshll.u32 %s217_s13, 3  ;;  %s858_s13 = scalar_lea.hbm %s906_s5, %s529_s8 }
  0x18   : > { %583 = vmatpush3.bf16.xpose.msk.msra.mxu0 %vm796_vm1, %v581_v11  ;;  %s219_s17 = scalar_lea.vmem %s901_s0, %s511_s14  ;;  %s434_s14 = scalar_lea.sflag [#allocation3], %s213_s26 }
  0x19   : > { %584 = vmatprep.subr.bf16.mxu0 %v706_v2  ;;  %599 = vmatpush3.bf16.xpose.msk.msra.mxu1 %vm594_vm4, %v597_v14  ;;  %v220_v21 = vld [vmem:[%s219_s17] sm:$0xff]  ;;  %p645_p13 = pneg %p644_p12  ;;  %s646_s16 = sshll.u32 %s709_s22, 4  ;;  %s647_s16 = int_to_ptr.vmem [resolvable:$false] %s646_s16 }
  0x1a   : > { %s648_s17 = scalar_lea.vmem %s647_s16, 256  ;;  %p649_p0 = scmp.lt.s32.totalorder %s860_s10, %s647_s16 }
  0x1b   : > { %p650_p1 = scmp.lt.s32.totalorder %s648_s17, %s642_s15 }
  0x1d   : > { %p651_p2 = por %p650_p1, %p649_p0 }
  0x1f   : > { %p652_p3 = pnand %p651_p2, %p645_p13 }
  0x20   : > { %587 = vmatpush3.bf16.xpose.msk.msra.mxu0 %vm796_vm1, %v585_v17 }
  0x21   : > { %588 = vmatprep.subr.bf16.mxu0 %v706_v2 }
  0x28   : > { %591 = vmatpush3.bf16.xpose.msk.msra.mxu0 %vm796_vm1, %v589_v20 }
  0x2f   : > { %563 = vmatmul.mubr.msk.f32.vlgmr.msra.gmra.mrb[0].mxu0 %vm236_vm0, %v220_v21 }
 0x102   : > { %v330_v23 = vpop.f32.mrb[0].mxu0 }
 0x103   : > { %v331_v24 = vadd.f32 %v512_v22, %v330_v23  ;;  %v564_v25 = vpop.f32.mrb[1].mxu0 }
 0x105   : > { %v334_v26 = vmax.f32 %v331_v24, 0.0 }
 0x107   : > { %574 = vmatmul.mubr.msk.f32.vlgmr.msra.gmra.mrb[0].mxu1 %vm346_vm2, %v334_v26 }
 0x1da   : > { %v428_v28 = vpop.f32.mrb[0].mxu1 }
 0x1db   : > { %v429_v29 = vadd.f32 %v522_v27, %v428_v28  ;;  %v575_v30 = vpop.f32.mrb[1].mxu1 }
 0x1dd   : > { %432 = vst.msk [vmem:[%s215_s9] sm:$0xff] %vm236_vm0, %v429_v29 }
 0x1de   : > { %655 = shalt.err (!%p652_p3)
}
 0x1df   : > { %s656_s23 = scalar_lea.hbm %s858_s13, 128  ;;  %s660_s30 = scalar_lea.hbm %s906_s5, 256 }
 0x1e0   : > { %p657_p4 = scmp.ne.s32.totalorder %s858_s13, %s656_s23  ;;  %p661_p9 = scmp.lt.u32.totalorder %s858_s13, %s906_s5 }
 0x1e1   : > { %p662_p10 = scmp.lt.u32.totalorder %s660_s30, %s656_s23  ;;  %p664_p12 = scmp.lt.u32.totalorder %s656_s23, %s858_s13 }
 0x1e2   : > { %p658_p7 = pnand %p657_p4, %p778_p5 }
 0x1e3   : > { %p663_p11 = por %p662_p10, %p661_p9 }
 0x1e4   : > { %p659_p8 = pneg %p658_p7 }
 0x1e5   : > { %p665_p13 = por %p664_p12, %p663_p11 }
 0x1e7   : > { %p666_p0 = pnand %p665_p13, %p659_p8 }
 0x1e9   : > { %669 = shalt.err (!%p666_p0)
}
 0x1ea   : > { %600 = dma.vmem_to_hbm [thread:$0]  (%p778_p5), %s860_s10, 128, %s858_s13, %s434_s14  }
 0x1eb PF: > { %p606_p1 = scmp.ge.s32.totalorder %s704_s21, 2  ;;  %s459_s8 = sand.u32 1, %s692_s18  }
 0x1ec   : > { %s460_s9 = scalar_lea.sflag [#allocation3], %s459_s8 }
 0x1ed   : > { %p603_p2 = pnand %p606_p1, %p782_p6 }
 0x1ef   : > { %687 = dma.done.wait (!%p603_p2), %s460_s9, 128  }
 0x1f0   : > { %689 = vsyncadd (!%p603_p2), %s460_s9, 4294967168  ;;  %p15_p3 = scmp.ge.s32.totalorder %s765_s24, 4   ;;  %s911_s18 = smov %s696_s19 }
 0x1f1   : > { %s912_s19 = smov %s700_s20  ;;  %s913_s20 = smov %s776_s27 }
 0x1f2   : > { %s914_s21 = smov %s765_s24  ;;  %17 = sbr.rel (!%p15_p3) target bundleno = 3 (0x3), region = 75 }
 0x1f9   :  { %465 = vsyncpa [#allocation3], 1 }
 0x1fa   :  { %467 = vsyncpa [#allocation3 + $0x1], 1 }

</bundles_post_ra>
